<compile_context>
chip_gen: v5e
topology: v5e:2x2
jax: 0.10.0
libtpu: 0.0.40
codegen_flags: <defaults>
</compile_context>

<pallas_src>
import math
import jax
import jax.numpy as jnp
import numpy as np
from jax.experimental import pallas as pl
from jax.experimental.pallas import tpu as pltpu

# ---- small, module-consistent shapes -------------------------------------
B           = 16     # batch (example)
FEATURES    = 32     # `features`
EMBED_DIM   = 32     # `embed_dim`
PATCH_SIZE  = 8      # `patch_size`
NUM_PATCHES = EMBED_DIM // PATCH_SIZE          # 4
SEQ         = NUM_PATCHES + 1                  # task token + patches = 5
NUM_CLASSES = 6      # `num_classes` (single task)

QKDIM   = SEQ * PATCH_SIZE                     # 40 rows per q / k / v group
OUT_PAD = 128                                  # lane-dense output rows (unmasked stores)
SCALE   = 1.0 / math.sqrt(PATCH_SIZE)


# ---- Pallas kernel (batch on the lane axis) --------------------------------
def dytox_kernel(xT_ref, w_qkv_ref, b_qkv_ref, w_tail_ref, b_tail_ref, out_ref):
    xT = xT_ref[...]                                                   # (FEATURES, TB)

    # one fused MXU matmul: tab_proj + q/k/v projections, already transposed.
    # (softmax scale is folded into the q rows of w_qkv; biases + task-token
    #  constants come in via the tiny (120,1) bias column.)
    qkv = jnp.dot(w_qkv_ref[...], xT,
                  preferred_element_type=jnp.float32)                  # (120, TB)
    qkv = qkv + b_qkv_ref[...]                                         # (120,1) lane-bcast

    q = qkv[0:QKDIM]                                                   # (40, TB)
    k = qkv[QKDIM:2 * QKDIM]
    v = qkv[2 * QKDIM:3 * QKDIM]
    q_t = [q[n * PATCH_SIZE:(n + 1) * PATCH_SIZE] for n in range(SEQ)]  # (8, TB) each
    k_t = [k[n * PATCH_SIZE:(n + 1) * PATCH_SIZE] for n in range(SEQ)]
    v_t = [v[n * PATCH_SIZE:(n + 1) * PATCH_SIZE] for n in range(SEQ)]

    # fully unrolled 5x5 attention: VPU multiplies + sublane (8->1) reductions,
    # EUP exp / approx reciprocal, batch fills all 128 lanes.
    ctx = []
    for n in range(SEQ):
        s = [jnp.sum(q_t[n] * k_t[m], axis=0, keepdims=True)           # (1, TB)
             for m in range(SEQ)]
        m_max = s[0]
        for m in range(1, SEQ):
            m_max = jnp.maximum(m_max, s[m])
        e = [jnp.exp(s[m] - m_max) for m in range(SEQ)]
        denom = e[0]
        for m in range(1, SEQ):
            denom = denom + e[m]
        acc = e[0] * v_t[0]                                             # (8, TB)
        for m in range(1, SEQ):
            acc = acc + e[m] * v_t[m]
        ctx.append(acc * pl.reciprocal(denom, approx=True))             # (8, TB)

    ctx_flat = jnp.concatenate(ctx, axis=0)                             # (40, TB)

    # fused (out-proj @ clf_proj @ expert) tail, transposed and lane-dense.
    out = jnp.dot(w_tail_ref[...], ctx_flat,
                  preferred_element_type=jnp.float32)                   # (OUT_PAD, TB)
    out_ref[...] = out + b_tail_ref[...]


# ---- host-side weight fusion ----------------------------------------------
def fuse_params(params):
    (tok, w_tab, b_tab, wq, bq, wk, bk, wv, bv,
     wo, bo, w_clf, b_clf, w_exp, b_exp) = params

    eye_p = jnp.eye(NUM_PATCHES, dtype=jnp.float32)
    tok2d = tok.reshape(1, PATCH_SIZE)

    def qkv_block(w, b, scale=1.0):
        # fold tab_proj through the per-token projection (block-diagonal kron)
        blk = jnp.kron(eye_p, w)                                      # (E, E)
        w_big = w_tab @ blk                                           # (F, E)
        b_big = b_tab @ blk + jnp.tile(b, (1, NUM_PATCHES))           # (1, E)
        tok_row = tok2d @ w + b                                       # (1, S) task-token proj
        w_cols = jnp.concatenate(
            [jnp.zeros((FEATURES, PATCH_SIZE), jnp.float32), w_big], axis=1)  # (F, 40)
        b_cols = jnp.concatenate([tok_row, b_big], axis=1)            # (1, 40)
        return w_cols * scale, b_cols * scale

    wq_c, bq_c = qkv_block(wq, bq, SCALE)   # softmax scale folded into q
    wk_c, bk_c = qkv_block(wk, bk)
    wv_c, bv_c = qkv_block(wv, bv)
    w_qkv = jnp.concatenate([wq_c, wk_c, wv_c], axis=1)               # (F, 120)
    b_qkv = jnp.concatenate([bq_c, bk_c, bv_c], axis=1)               # (1, 120)

    # tail: (ctx @ wo + bo) -> flatten -> clf_proj -> expert, folded to one matmul
    w_o_blk = jnp.kron(jnp.eye(SEQ, dtype=jnp.float32), wo)           # (40, 40)
    b_o_blk = jnp.tile(bo, (1, SEQ))                                  # (1, 40)
    w_tail = w_o_blk @ w_clf @ w_exp                                  # (40, C)
    b_tail = (b_o_blk @ w_clf + b_clf) @ w_exp + b_exp                # (1, C)

    w_tail_pad = jnp.zeros((QKDIM, OUT_PAD), jnp.float32).at[:, :NUM_CLASSES].set(w_tail)
    b_tail_pad = jnp.zeros((1, OUT_PAD), jnp.float32).at[:, :NUM_CLASSES].set(b_tail)

    # transposed (batch-in-lanes) layouts consumed by the kernel
    return (jnp.asarray(w_qkv.T),        # (120, 32)
            jnp.asarray(b_qkv.T),        # (120, 1)
            jnp.asarray(w_tail_pad.T),   # (128, 40)
            jnp.asarray(b_tail_pad.T))   # (128, 1)


# ---- wrapper ---------------------------------------------------------------
def dytox_forward(x, fused, tb=None):
    w_qkv_T, b_qkv_T, w_tail_T, b_tail_T = fused
    b = x.shape[0]
    if tb is None:
        # multiple of 128 (v5e MXU rows); 256 fills v6e/v7x MXU rows.  For very
        # large batches this still leaves >= 2 grid steps so v7x megacore
        # ("parallel") can shard the batch tiles across both TensorCores.
        tb = 128 if b <= 128 else 256
    b_pad = pl.cdiv(b, tb) * tb

    # transpose once: batch on the lane axis, zero-padded to the tile width.
    xT = jnp.zeros((FEATURES, b_pad), jnp.float32).at[:, :b].set(
        x.astype(jnp.float32).T)

    out_T = pl.pallas_call(
        dytox_kernel,
        out_shape=jax.ShapeDtypeStruct((OUT_PAD, b_pad), jnp.float32),
        grid_spec=pltpu.PrefetchScalarGridSpec(
            num_scalar_prefetch=0,
            grid=(b_pad // tb,),
            in_specs=[
                pl.BlockSpec((FEATURES, tb), lambda i: (0, i)),
                # invariant weights: constant block index -> no per-step re-DMA
                pl.BlockSpec(w_qkv_T.shape, lambda i: (0, 0)),
                pl.BlockSpec(b_qkv_T.shape, lambda i: (0, 0)),
                pl.BlockSpec(w_tail_T.shape, lambda i: (0, 0)),
                pl.BlockSpec(b_tail_T.shape, lambda i: (0, 0)),
            ],
            out_specs=pl.BlockSpec((OUT_PAD, tb), lambda i: (0, i)),
        ),
        compiler_params=pltpu.CompilerParams(
            dimension_semantics=("parallel",)),
    )(xT, w_qkv_T, b_qkv_T, w_tail_T, b_tail_T)

    # tiny (6, b) slice + transpose on the host
    return out_T[:NUM_CLASSES, :b].T


# ---- pure-JAX reference (unfused math) for validation ----------------------
def dytox_reference(x, params):
    (tok, w_tab, b_tab, wq, bq, wk, bk, wv, bv,
     wo, bo, w_clf, b_clf, w_exp, b_exp) = params
    b = x.shape[0]
    xx = (x @ w_tab + b_tab).reshape(b, NUM_PATCHES, PATCH_SIZE)
    seq = jnp.concatenate(
        [jnp.broadcast_to(tok, (b, 1, PATCH_SIZE)), xx], axis=1)
    q = jnp.einsum('bnd,de->bne', seq, wq) + bq
    k = jnp.einsum('bnd,de->bne', seq, wk) + bk
    v = jnp.einsum('bnd,de->bne', seq, wv) + bv
    s = jnp.einsum('bnd,bmd->bnm', q, k) * SCALE
    p = jax.nn.softmax(s, axis=-1)
    a = jnp.einsum('bnm,bmd->bnd', p, v)
    a = jnp.einsum('bnd,de->bne', a, wo) + bo
    emb = a.reshape(b, SEQ * PATCH_SIZE) @ w_clf + b_clf
    return emb @ w_exp + b_exp


# ---- deterministic parameter init ------------------------------------------
def make_params(key):
    ks = jax.random.split(key, 14)

    def linear(kw, kb, fan_in, fan_out):
        bound = 1.0 / math.sqrt(fan_in)
        w = jax.random.uniform(kw, (fan_in, fan_out), jnp.float32, -bound, bound)
        b = jax.random.uniform(kb, (1, fan_out), jnp.float32, -bound, bound)
        return w, b

    # task token: nn.Parameter(torch.zeros(1, 1, patch_size))
    tok = jnp.zeros((1, 1, PATCH_SIZE), jnp.float32)

    w_tab, b_tab = linear(ks[0], ks[1], FEATURES, EMBED_DIM)
    wq, bq = linear(ks[2], ks[3], PATCH_SIZE, PATCH_SIZE)
    wk, bk = linear(ks[4], ks[5], PATCH_SIZE, PATCH_SIZE)
    wv, bv = linear(ks[6], ks[7], PATCH_SIZE, PATCH_SIZE)
    wo, bo = linear(ks[8], ks[9], PATCH_SIZE, PATCH_SIZE)
    w_clf, b_clf = linear(ks[10], ks[11], PATCH_SIZE * SEQ, EMBED_DIM)
    w_exp, b_exp = linear(ks[12], ks[13], EMBED_DIM, NUM_CLASSES)

    return (tok, w_tab, b_tab, wq, bq, wk, bk, wv, bv,
            wo, bo, w_clf, b_clf, w_exp, b_exp)


if __name__ == "__main__":
    key = jax.random.PRNGKey(0)
    k_x, k_p = jax.random.split(key)
    x = jax.random.normal(k_x, (B, FEATURES), jnp.float32)
    params = make_params(k_p)

    fused = fuse_params(params)
    fwd = jax.jit(lambda xx: dytox_forward(xx, fused))
    out = jax.block_until_ready(fwd(x))

    ref = dytox_reference(x, params)
    # tolerance accounts for f32 reassociation of the fused weights and the
    # approximate (EUP) reciprocal in the softmax.
    np.testing.assert_allclose(np.asarray(out), np.asarray(ref),
                               rtol=2e-3, atol=2e-3)
    assert out.shape == (B, NUM_CLASSES)
    print("KERNEL_OK")
</pallas_src>

<mosaic_0001>
module attributes {stable_mosaic.version = 11 : i64} {
  func.func @dytox_kernel(%arg0: i32, %arg1: memref<32x128xf32, #tpu.memory_space<vmem>>, %arg2: memref<120x32xf32, #tpu.memory_space<vmem>>, %arg3: memref<120x1xf32, #tpu.memory_space<vmem>>, %arg4: memref<128x40xf32, #tpu.memory_space<vmem>>, %arg5: memref<128x1xf32, #tpu.memory_space<vmem>>, %arg6: memref<128x128xf32, #tpu.memory_space<vmem>>) attributes {dimension_semantics = [#tpu.dimension_semantics<parallel>], iteration_bounds = array<i64: 1>, scalar_prefetch = 0 : i64, scratch_operands = 0 : i64, tpu.core_type = #tpu.core_type<tc>, window_params = [{transform_indices = @transform_0, window_bounds = array<i64: 32, 128>}, {pipeline_mode = #tpu.pipeline_mode<synchronous>, transform_indices = @transform_1, window_bounds = array<i64: 120, 32>}, {pipeline_mode = #tpu.pipeline_mode<synchronous>, transform_indices = @transform_2, window_bounds = array<i64: 120, 1>}, {pipeline_mode = #tpu.pipeline_mode<synchronous>, transform_indices = @transform_3, window_bounds = array<i64: 128, 40>}, {pipeline_mode = #tpu.pipeline_mode<synchronous>, transform_indices = @transform_4, window_bounds = array<i64: 128, 1>}, {transform_indices = @transform_5, window_bounds = array<i64: 128, 128>}]} {
    %c0 = arith.constant 0 : index
    %c0_0 = arith.constant 0 : index
    %0 = vector.load %arg1[%c0, %c0_0] : memref<32x128xf32, #tpu.memory_space<vmem>>, vector<32x128xf32>
    %c0_1 = arith.constant 0 : index
    %c0_2 = arith.constant 0 : index
    %1 = vector.load %arg2[%c0_1, %c0_2] : memref<120x32xf32, #tpu.memory_space<vmem>>, vector<120x32xf32>
    %cst = arith.constant dense<0.000000e+00> : vector<120x128xf32>
    %2 = tpu.matmul %1, %0, %cst {dimension_numbers = #tpu.dot_dimension_numbers<[1], [0], [0], [1], [0, 0, 1, 1], [], []>} : vector<120x32xf32>, vector<32x128xf32>, vector<120x128xf32> -> vector<120x128xf32>
    %c0_3 = arith.constant 0 : index
    %c0_4 = arith.constant 0 : index
    %3 = vector.load %arg3[%c0_3, %c0_4] : memref<120x1xf32, #tpu.memory_space<vmem>>, vector<120x1xf32>
    %4 = vector.broadcast %3 : vector<120x1xf32> to vector<120x128xf32>
    %5 = arith.addf %2, %4 : vector<120x128xf32>
    %6 = vector.extract_strided_slice %5 {offsets = [0, 0], sizes = [40, 128], strides = [1, 1]} : vector<120x128xf32> to vector<40x128xf32>
    %7 = vector.extract_strided_slice %5 {offsets = [40, 0], sizes = [40, 128], strides = [1, 1]} : vector<120x128xf32> to vector<40x128xf32>
    %8 = vector.extract_strided_slice %5 {offsets = [80, 0], sizes = [40, 128], strides = [1, 1]} : vector<120x128xf32> to vector<40x128xf32>
    %9 = vector.extract_strided_slice %6 {offsets = [0, 0], sizes = [8, 128], strides = [1, 1]} : vector<40x128xf32> to vector<8x128xf32>
    %10 = vector.extract_strided_slice %6 {offsets = [8, 0], sizes = [8, 128], strides = [1, 1]} : vector<40x128xf32> to vector<8x128xf32>
    %11 = vector.extract_strided_slice %6 {offsets = [16, 0], sizes = [8, 128], strides = [1, 1]} : vector<40x128xf32> to vector<8x128xf32>
    %12 = vector.extract_strided_slice %6 {offsets = [24, 0], sizes = [8, 128], strides = [1, 1]} : vector<40x128xf32> to vector<8x128xf32>
    %13 = vector.extract_strided_slice %6 {offsets = [32, 0], sizes = [8, 128], strides = [1, 1]} : vector<40x128xf32> to vector<8x128xf32>
    %14 = vector.extract_strided_slice %7 {offsets = [0, 0], sizes = [8, 128], strides = [1, 1]} : vector<40x128xf32> to vector<8x128xf32>
    %15 = vector.extract_strided_slice %7 {offsets = [8, 0], sizes = [8, 128], strides = [1, 1]} : vector<40x128xf32> to vector<8x128xf32>
    %16 = vector.extract_strided_slice %7 {offsets = [16, 0], sizes = [8, 128], strides = [1, 1]} : vector<40x128xf32> to vector<8x128xf32>
    %17 = vector.extract_strided_slice %7 {offsets = [24, 0], sizes = [8, 128], strides = [1, 1]} : vector<40x128xf32> to vector<8x128xf32>
    %18 = vector.extract_strided_slice %7 {offsets = [32, 0], sizes = [8, 128], strides = [1, 1]} : vector<40x128xf32> to vector<8x128xf32>
    %19 = vector.extract_strided_slice %8 {offsets = [0, 0], sizes = [8, 128], strides = [1, 1]} : vector<40x128xf32> to vector<8x128xf32>
    %20 = vector.extract_strided_slice %8 {offsets = [8, 0], sizes = [8, 128], strides = [1, 1]} : vector<40x128xf32> to vector<8x128xf32>
    %21 = vector.extract_strided_slice %8 {offsets = [16, 0], sizes = [8, 128], strides = [1, 1]} : vector<40x128xf32> to vector<8x128xf32>
    %22 = vector.extract_strided_slice %8 {offsets = [24, 0], sizes = [8, 128], strides = [1, 1]} : vector<40x128xf32> to vector<8x128xf32>
    %23 = vector.extract_strided_slice %8 {offsets = [32, 0], sizes = [8, 128], strides = [1, 1]} : vector<40x128xf32> to vector<8x128xf32>
    %24 = arith.mulf %9, %14 : vector<8x128xf32>
    %cst_5 = arith.constant dense<0.000000e+00> : vector<128xf32>
    %25 = vector.multi_reduction <add>, %24, %cst_5 [0] : vector<8x128xf32> to vector<128xf32>
    %26 = vector.shape_cast %25 : vector<128xf32> to vector<1x128xf32>
    %27 = arith.mulf %9, %15 : vector<8x128xf32>
    %cst_6 = arith.constant dense<0.000000e+00> : vector<128xf32>
    %28 = vector.multi_reduction <add>, %27, %cst_6 [0] : vector<8x128xf32> to vector<128xf32>
    %29 = vector.shape_cast %28 : vector<128xf32> to vector<1x128xf32>
    %30 = arith.mulf %9, %16 : vector<8x128xf32>
    %cst_7 = arith.constant dense<0.000000e+00> : vector<128xf32>
    %31 = vector.multi_reduction <add>, %30, %cst_7 [0] : vector<8x128xf32> to vector<128xf32>
    %32 = vector.shape_cast %31 : vector<128xf32> to vector<1x128xf32>
    %33 = arith.mulf %9, %17 : vector<8x128xf32>
    %cst_8 = arith.constant dense<0.000000e+00> : vector<128xf32>
    %34 = vector.multi_reduction <add>, %33, %cst_8 [0] : vector<8x128xf32> to vector<128xf32>
    %35 = vector.shape_cast %34 : vector<128xf32> to vector<1x128xf32>
    %36 = arith.mulf %9, %18 : vector<8x128xf32>
    %cst_9 = arith.constant dense<0.000000e+00> : vector<128xf32>
    %37 = vector.multi_reduction <add>, %36, %cst_9 [0] : vector<8x128xf32> to vector<128xf32>
    %38 = vector.shape_cast %37 : vector<128xf32> to vector<1x128xf32>
    %39 = arith.maximumf %26, %29 : vector<1x128xf32>
    %40 = arith.maximumf %39, %32 : vector<1x128xf32>
    %41 = arith.maximumf %40, %35 : vector<1x128xf32>
    %42 = arith.maximumf %41, %38 : vector<1x128xf32>
    %43 = arith.subf %26, %42 : vector<1x128xf32>
    %44 = math.exp %43 : vector<1x128xf32>
    %45 = arith.subf %29, %42 : vector<1x128xf32>
    %46 = math.exp %45 : vector<1x128xf32>
    %47 = arith.subf %32, %42 : vector<1x128xf32>
    %48 = math.exp %47 : vector<1x128xf32>
    %49 = arith.subf %35, %42 : vector<1x128xf32>
    %50 = math.exp %49 : vector<1x128xf32>
    %51 = arith.subf %38, %42 : vector<1x128xf32>
    %52 = math.exp %51 : vector<1x128xf32>
    %53 = arith.addf %44, %46 : vector<1x128xf32>
    %54 = arith.addf %53, %48 : vector<1x128xf32>
    %55 = arith.addf %54, %50 : vector<1x128xf32>
    %56 = arith.addf %55, %52 : vector<1x128xf32>
    %57 = vector.broadcast %44 : vector<1x128xf32> to vector<8x128xf32>
    %58 = arith.mulf %57, %19 : vector<8x128xf32>
    %59 = vector.broadcast %46 : vector<1x128xf32> to vector<8x128xf32>
    %60 = arith.mulf %59, %20 : vector<8x128xf32>
    %61 = arith.addf %58, %60 : vector<8x128xf32>
    %62 = vector.broadcast %48 : vector<1x128xf32> to vector<8x128xf32>
    %63 = arith.mulf %62, %21 : vector<8x128xf32>
    %64 = arith.addf %61, %63 : vector<8x128xf32>
    %65 = vector.broadcast %50 : vector<1x128xf32> to vector<8x128xf32>
    %66 = arith.mulf %65, %22 : vector<8x128xf32>
    %67 = arith.addf %64, %66 : vector<8x128xf32>
    %68 = vector.broadcast %52 : vector<1x128xf32> to vector<8x128xf32>
    %69 = arith.mulf %68, %23 : vector<8x128xf32>
    %70 = arith.addf %67, %69 : vector<8x128xf32>
    %71 = tpu.reciprocal %56 {approx = true} : vector<1x128xf32> -> vector<1x128xf32>
    %72 = vector.broadcast %71 : vector<1x128xf32> to vector<8x128xf32>
    %73 = arith.mulf %70, %72 : vector<8x128xf32>
    %74 = arith.mulf %10, %14 : vector<8x128xf32>
    %cst_10 = arith.constant dense<0.000000e+00> : vector<128xf32>
    %75 = vector.multi_reduction <add>, %74, %cst_10 [0] : vector<8x128xf32> to vector<128xf32>
    %76 = vector.shape_cast %75 : vector<128xf32> to vector<1x128xf32>
    %77 = arith.mulf %10, %15 : vector<8x128xf32>
    %cst_11 = arith.constant dense<0.000000e+00> : vector<128xf32>
    %78 = vector.multi_reduction <add>, %77, %cst_11 [0] : vector<8x128xf32> to vector<128xf32>
    %79 = vector.shape_cast %78 : vector<128xf32> to vector<1x128xf32>
    %80 = arith.mulf %10, %16 : vector<8x128xf32>
    %cst_12 = arith.constant dense<0.000000e+00> : vector<128xf32>
    %81 = vector.multi_reduction <add>, %80, %cst_12 [0] : vector<8x128xf32> to vector<128xf32>
    %82 = vector.shape_cast %81 : vector<128xf32> to vector<1x128xf32>
    %83 = arith.mulf %10, %17 : vector<8x128xf32>
    %cst_13 = arith.constant dense<0.000000e+00> : vector<128xf32>
    %84 = vector.multi_reduction <add>, %83, %cst_13 [0] : vector<8x128xf32> to vector<128xf32>
    %85 = vector.shape_cast %84 : vector<128xf32> to vector<1x128xf32>
    %86 = arith.mulf %10, %18 : vector<8x128xf32>
    %cst_14 = arith.constant dense<0.000000e+00> : vector<128xf32>
    %87 = vector.multi_reduction <add>, %86, %cst_14 [0] : vector<8x128xf32> to vector<128xf32>
    %88 = vector.shape_cast %87 : vector<128xf32> to vector<1x128xf32>
    %89 = arith.maximumf %76, %79 : vector<1x128xf32>
    %90 = arith.maximumf %89, %82 : vector<1x128xf32>
    %91 = arith.maximumf %90, %85 : vector<1x128xf32>
    %92 = arith.maximumf %91, %88 : vector<1x128xf32>
    %93 = arith.subf %76, %92 : vector<1x128xf32>
    %94 = math.exp %93 : vector<1x128xf32>
    %95 = arith.subf %79, %92 : vector<1x128xf32>
    %96 = math.exp %95 : vector<1x128xf32>
    %97 = arith.subf %82, %92 : vector<1x128xf32>
    %98 = math.exp %97 : vector<1x128xf32>
    %99 = arith.subf %85, %92 : vector<1x128xf32>
    %100 = math.exp %99 : vector<1x128xf32>
    %101 = arith.subf %88, %92 : vector<1x128xf32>
    %102 = math.exp %101 : vector<1x128xf32>
    %103 = arith.addf %94, %96 : vector<1x128xf32>
    %104 = arith.addf %103, %98 : vector<1x128xf32>
    %105 = arith.addf %104, %100 : vector<1x128xf32>
    %106 = arith.addf %105, %102 : vector<1x128xf32>
    %107 = vector.broadcast %94 : vector<1x128xf32> to vector<8x128xf32>
    %108 = arith.mulf %107, %19 : vector<8x128xf32>
    %109 = vector.broadcast %96 : vector<1x128xf32> to vector<8x128xf32>
    %110 = arith.mulf %109, %20 : vector<8x128xf32>
    %111 = arith.addf %108, %110 : vector<8x128xf32>
    %112 = vector.broadcast %98 : vector<1x128xf32> to vector<8x128xf32>
    %113 = arith.mulf %112, %21 : vector<8x128xf32>
    %114 = arith.addf %111, %113 : vector<8x128xf32>
    %115 = vector.broadcast %100 : vector<1x128xf32> to vector<8x128xf32>
    %116 = arith.mulf %115, %22 : vector<8x128xf32>
    %117 = arith.addf %114, %116 : vector<8x128xf32>
    %118 = vector.broadcast %102 : vector<1x128xf32> to vector<8x128xf32>
    %119 = arith.mulf %118, %23 : vector<8x128xf32>
    %120 = arith.addf %117, %119 : vector<8x128xf32>
    %121 = tpu.reciprocal %106 {approx = true} : vector<1x128xf32> -> vector<1x128xf32>
    %122 = vector.broadcast %121 : vector<1x128xf32> to vector<8x128xf32>
    %123 = arith.mulf %120, %122 : vector<8x128xf32>
    %124 = arith.mulf %11, %14 : vector<8x128xf32>
    %cst_15 = arith.constant dense<0.000000e+00> : vector<128xf32>
    %125 = vector.multi_reduction <add>, %124, %cst_15 [0] : vector<8x128xf32> to vector<128xf32>
    %126 = vector.shape_cast %125 : vector<128xf32> to vector<1x128xf32>
    %127 = arith.mulf %11, %15 : vector<8x128xf32>
    %cst_16 = arith.constant dense<0.000000e+00> : vector<128xf32>
    %128 = vector.multi_reduction <add>, %127, %cst_16 [0] : vector<8x128xf32> to vector<128xf32>
    %129 = vector.shape_cast %128 : vector<128xf32> to vector<1x128xf32>
    %130 = arith.mulf %11, %16 : vector<8x128xf32>
    %cst_17 = arith.constant dense<0.000000e+00> : vector<128xf32>
    %131 = vector.multi_reduction <add>, %130, %cst_17 [0] : vector<8x128xf32> to vector<128xf32>
    %132 = vector.shape_cast %131 : vector<128xf32> to vector<1x128xf32>
    %133 = arith.mulf %11, %17 : vector<8x128xf32>
    %cst_18 = arith.constant dense<0.000000e+00> : vector<128xf32>
    %134 = vector.multi_reduction <add>, %133, %cst_18 [0] : vector<8x128xf32> to vector<128xf32>
    %135 = vector.shape_cast %134 : vector<128xf32> to vector<1x128xf32>
    %136 = arith.mulf %11, %18 : vector<8x128xf32>
    %cst_19 = arith.constant dense<0.000000e+00> : vector<128xf32>
    %137 = vector.multi_reduction <add>, %136, %cst_19 [0] : vector<8x128xf32> to vector<128xf32>
    %138 = vector.shape_cast %137 : vector<128xf32> to vector<1x128xf32>
    %139 = arith.maximumf %126, %129 : vector<1x128xf32>
    %140 = arith.maximumf %139, %132 : vector<1x128xf32>
    %141 = arith.maximumf %140, %135 : vector<1x128xf32>
    %142 = arith.maximumf %141, %138 : vector<1x128xf32>
    %143 = arith.subf %126, %142 : vector<1x128xf32>
    %144 = math.exp %143 : vector<1x128xf32>
    %145 = arith.subf %129, %142 : vector<1x128xf32>
    %146 = math.exp %145 : vector<1x128xf32>
    %147 = arith.subf %132, %142 : vector<1x128xf32>
    %148 = math.exp %147 : vector<1x128xf32>
    %149 = arith.subf %135, %142 : vector<1x128xf32>
    %150 = math.exp %149 : vector<1x128xf32>
    %151 = arith.subf %138, %142 : vector<1x128xf32>
    %152 = math.exp %151 : vector<1x128xf32>
    %153 = arith.addf %144, %146 : vector<1x128xf32>
    %154 = arith.addf %153, %148 : vector<1x128xf32>
    %155 = arith.addf %154, %150 : vector<1x128xf32>
    %156 = arith.addf %155, %152 : vector<1x128xf32>
    %157 = vector.broadcast %144 : vector<1x128xf32> to vector<8x128xf32>
    %158 = arith.mulf %157, %19 : vector<8x128xf32>
    %159 = vector.broadcast %146 : vector<1x128xf32> to vector<8x128xf32>
    %160 = arith.mulf %159, %20 : vector<8x128xf32>
    %161 = arith.addf %158, %160 : vector<8x128xf32>
    %162 = vector.broadcast %148 : vector<1x128xf32> to vector<8x128xf32>
    %163 = arith.mulf %162, %21 : vector<8x128xf32>
    %164 = arith.addf %161, %163 : vector<8x128xf32>
    %165 = vector.broadcast %150 : vector<1x128xf32> to vector<8x128xf32>
    %166 = arith.mulf %165, %22 : vector<8x128xf32>
    %167 = arith.addf %164, %166 : vector<8x128xf32>
    %168 = vector.broadcast %152 : vector<1x128xf32> to vector<8x128xf32>
    %169 = arith.mulf %168, %23 : vector<8x128xf32>
    %170 = arith.addf %167, %169 : vector<8x128xf32>
    %171 = tpu.reciprocal %156 {approx = true} : vector<1x128xf32> -> vector<1x128xf32>
    %172 = vector.broadcast %171 : vector<1x128xf32> to vector<8x128xf32>
    %173 = arith.mulf %170, %172 : vector<8x128xf32>
    %174 = arith.mulf %12, %14 : vector<8x128xf32>
    %cst_20 = arith.constant dense<0.000000e+00> : vector<128xf32>
    %175 = vector.multi_reduction <add>, %174, %cst_20 [0] : vector<8x128xf32> to vector<128xf32>
    %176 = vector.shape_cast %175 : vector<128xf32> to vector<1x128xf32>
    %177 = arith.mulf %12, %15 : vector<8x128xf32>
    %cst_21 = arith.constant dense<0.000000e+00> : vector<128xf32>
    %178 = vector.multi_reduction <add>, %177, %cst_21 [0] : vector<8x128xf32> to vector<128xf32>
    %179 = vector.shape_cast %178 : vector<128xf32> to vector<1x128xf32>
    %180 = arith.mulf %12, %16 : vector<8x128xf32>
    %cst_22 = arith.constant dense<0.000000e+00> : vector<128xf32>
    %181 = vector.multi_reduction <add>, %180, %cst_22 [0] : vector<8x128xf32> to vector<128xf32>
    %182 = vector.shape_cast %181 : vector<128xf32> to vector<1x128xf32>
    %183 = arith.mulf %12, %17 : vector<8x128xf32>
    %cst_23 = arith.constant dense<0.000000e+00> : vector<128xf32>
    %184 = vector.multi_reduction <add>, %183, %cst_23 [0] : vector<8x128xf32> to vector<128xf32>
    %185 = vector.shape_cast %184 : vector<128xf32> to vector<1x128xf32>
    %186 = arith.mulf %12, %18 : vector<8x128xf32>
    %cst_24 = arith.constant dense<0.000000e+00> : vector<128xf32>
    %187 = vector.multi_reduction <add>, %186, %cst_24 [0] : vector<8x128xf32> to vector<128xf32>
    %188 = vector.shape_cast %187 : vector<128xf32> to vector<1x128xf32>
    %189 = arith.maximumf %176, %179 : vector<1x128xf32>
    %190 = arith.maximumf %189, %182 : vector<1x128xf32>
    %191 = arith.maximumf %190, %185 : vector<1x128xf32>
    %192 = arith.maximumf %191, %188 : vector<1x128xf32>
    %193 = arith.subf %176, %192 : vector<1x128xf32>
    %194 = math.exp %193 : vector<1x128xf32>
    %195 = arith.subf %179, %192 : vector<1x128xf32>
    %196 = math.exp %195 : vector<1x128xf32>
    %197 = arith.subf %182, %192 : vector<1x128xf32>
    %198 = math.exp %197 : vector<1x128xf32>
    %199 = arith.subf %185, %192 : vector<1x128xf32>
    %200 = math.exp %199 : vector<1x128xf32>
    %201 = arith.subf %188, %192 : vector<1x128xf32>
    %202 = math.exp %201 : vector<1x128xf32>
    %203 = arith.addf %194, %196 : vector<1x128xf32>
    %204 = arith.addf %203, %198 : vector<1x128xf32>
    %205 = arith.addf %204, %200 : vector<1x128xf32>
    %206 = arith.addf %205, %202 : vector<1x128xf32>
    %207 = vector.broadcast %194 : vector<1x128xf32> to vector<8x128xf32>
    %208 = arith.mulf %207, %19 : vector<8x128xf32>
    %209 = vector.broadcast %196 : vector<1x128xf32> to vector<8x128xf32>
    %210 = arith.mulf %209, %20 : vector<8x128xf32>
    %211 = arith.addf %208, %210 : vector<8x128xf32>
    %212 = vector.broadcast %198 : vector<1x128xf32> to vector<8x128xf32>
    %213 = arith.mulf %212, %21 : vector<8x128xf32>
    %214 = arith.addf %211, %213 : vector<8x128xf32>
    %215 = vector.broadcast %200 : vector<1x128xf32> to vector<8x128xf32>
    %216 = arith.mulf %215, %22 : vector<8x128xf32>
    %217 = arith.addf %214, %216 : vector<8x128xf32>
    %218 = vector.broadcast %202 : vector<1x128xf32> to vector<8x128xf32>
    %219 = arith.mulf %218, %23 : vector<8x128xf32>
    %220 = arith.addf %217, %219 : vector<8x128xf32>
    %221 = tpu.reciprocal %206 {approx = true} : vector<1x128xf32> -> vector<1x128xf32>
    %222 = vector.broadcast %221 : vector<1x128xf32> to vector<8x128xf32>
    %223 = arith.mulf %220, %222 : vector<8x128xf32>
    %224 = arith.mulf %13, %14 : vector<8x128xf32>
    %cst_25 = arith.constant dense<0.000000e+00> : vector<128xf32>
    %225 = vector.multi_reduction <add>, %224, %cst_25 [0] : vector<8x128xf32> to vector<128xf32>
    %226 = vector.shape_cast %225 : vector<128xf32> to vector<1x128xf32>
    %227 = arith.mulf %13, %15 : vector<8x128xf32>
    %cst_26 = arith.constant dense<0.000000e+00> : vector<128xf32>
    %228 = vector.multi_reduction <add>, %227, %cst_26 [0] : vector<8x128xf32> to vector<128xf32>
    %229 = vector.shape_cast %228 : vector<128xf32> to vector<1x128xf32>
    %230 = arith.mulf %13, %16 : vector<8x128xf32>
    %cst_27 = arith.constant dense<0.000000e+00> : vector<128xf32>
    %231 = vector.multi_reduction <add>, %230, %cst_27 [0] : vector<8x128xf32> to vector<128xf32>
    %232 = vector.shape_cast %231 : vector<128xf32> to vector<1x128xf32>
    %233 = arith.mulf %13, %17 : vector<8x128xf32>
    %cst_28 = arith.constant dense<0.000000e+00> : vector<128xf32>
    %234 = vector.multi_reduction <add>, %233, %cst_28 [0] : vector<8x128xf32> to vector<128xf32>
    %235 = vector.shape_cast %234 : vector<128xf32> to vector<1x128xf32>
    %236 = arith.mulf %13, %18 : vector<8x128xf32>
    %cst_29 = arith.constant dense<0.000000e+00> : vector<128xf32>
    %237 = vector.multi_reduction <add>, %236, %cst_29 [0] : vector<8x128xf32> to vector<128xf32>
    %238 = vector.shape_cast %237 : vector<128xf32> to vector<1x128xf32>
    %239 = arith.maximumf %226, %229 : vector<1x128xf32>
    %240 = arith.maximumf %239, %232 : vector<1x128xf32>
    %241 = arith.maximumf %240, %235 : vector<1x128xf32>
    %242 = arith.maximumf %241, %238 : vector<1x128xf32>
    %243 = arith.subf %226, %242 : vector<1x128xf32>
    %244 = math.exp %243 : vector<1x128xf32>
    %245 = arith.subf %229, %242 : vector<1x128xf32>
    %246 = math.exp %245 : vector<1x128xf32>
    %247 = arith.subf %232, %242 : vector<1x128xf32>
    %248 = math.exp %247 : vector<1x128xf32>
    %249 = arith.subf %235, %242 : vector<1x128xf32>
    %250 = math.exp %249 : vector<1x128xf32>
    %251 = arith.subf %238, %242 : vector<1x128xf32>
    %252 = math.exp %251 : vector<1x128xf32>
    %253 = arith.addf %244, %246 : vector<1x128xf32>
    %254 = arith.addf %253, %248 : vector<1x128xf32>
    %255 = arith.addf %254, %250 : vector<1x128xf32>
    %256 = arith.addf %255, %252 : vector<1x128xf32>
    %257 = vector.broadcast %244 : vector<1x128xf32> to vector<8x128xf32>
    %258 = arith.mulf %257, %19 : vector<8x128xf32>
    %259 = vector.broadcast %246 : vector<1x128xf32> to vector<8x128xf32>
    %260 = arith.mulf %259, %20 : vector<8x128xf32>
    %261 = arith.addf %258, %260 : vector<8x128xf32>
    %262 = vector.broadcast %248 : vector<1x128xf32> to vector<8x128xf32>
    %263 = arith.mulf %262, %21 : vector<8x128xf32>
    %264 = arith.addf %261, %263 : vector<8x128xf32>
    %265 = vector.broadcast %250 : vector<1x128xf32> to vector<8x128xf32>
    %266 = arith.mulf %265, %22 : vector<8x128xf32>
    %267 = arith.addf %264, %266 : vector<8x128xf32>
    %268 = vector.broadcast %252 : vector<1x128xf32> to vector<8x128xf32>
    %269 = arith.mulf %268, %23 : vector<8x128xf32>
    %270 = arith.addf %267, %269 : vector<8x128xf32>
    %271 = tpu.reciprocal %256 {approx = true} : vector<1x128xf32> -> vector<1x128xf32>
    %272 = vector.broadcast %271 : vector<1x128xf32> to vector<8x128xf32>
    %273 = arith.mulf %270, %272 : vector<8x128xf32>
    %274 = tpu.concatenate %73, %123, %173, %223, %273 in 0 : vector<8x128xf32>, vector<8x128xf32>, vector<8x128xf32>, vector<8x128xf32>, vector<8x128xf32> -> vector<40x128xf32>
    %c0_30 = arith.constant 0 : index
    %c0_31 = arith.constant 0 : index
    %275 = vector.load %arg4[%c0_30, %c0_31] : memref<128x40xf32, #tpu.memory_space<vmem>>, vector<128x40xf32>
    %cst_32 = arith.constant dense<0.000000e+00> : vector<128x128xf32>
    %276 = tpu.matmul %275, %274, %cst_32 {dimension_numbers = #tpu.dot_dimension_numbers<[1], [0], [0], [1], [0, 0, 1, 1], [], []>} : vector<128x40xf32>, vector<40x128xf32>, vector<128x128xf32> -> vector<128x128xf32>
    %c0_33 = arith.constant 0 : index
    %c0_34 = arith.constant 0 : index
    %277 = vector.load %arg5[%c0_33, %c0_34] : memref<128x1xf32, #tpu.memory_space<vmem>>, vector<128x1xf32>
    %278 = vector.broadcast %277 : vector<128x1xf32> to vector<128x128xf32>
    %279 = arith.addf %276, %278 : vector<128x128xf32>
    %c0_35 = arith.constant 0 : index
    %c0_36 = arith.constant 0 : index
    %280 = vector.load %arg6[%c0_35, %c0_36] : memref<128x128xf32, #tpu.memory_space<vmem>>, vector<128x128xf32>
    tpu.vector_store %arg6[%c0_35, %c0_36], %279 {strides = array<i32>} : memref<128x128xf32, #tpu.memory_space<vmem>>, vector<128x128xf32>,
    return
  }
  func.func @transform_0(%arg0: i32) -> (i32, i32) {
    %c0_i32 = arith.constant 0 : i32
    %c0_i32_0 = arith.constant 0 : i32
    return %c0_i32, %arg0 : i32, i32
  }
  func.func @transform_1(%arg0: i32) -> (i32, i32) {
    %c0_i32 = arith.constant 0 : i32
    %c0_i32_0 = arith.constant 0 : i32
    %c0_i32_1 = arith.constant 0 : i32
    return %c0_i32, %c0_i32_0 : i32, i32
  }
  func.func @transform_2(%arg0: i32) -> (i32, i32) {
    %c0_i32 = arith.constant 0 : i32
    %c0_i32_0 = arith.constant 0 : i32
    %c0_i32_1 = arith.constant 0 : i32
    return %c0_i32, %c0_i32_0 : i32, i32
  }
  func.func @transform_3(%arg0: i32) -> (i32, i32) {
    %c0_i32 = arith.constant 0 : i32
    %c0_i32_0 = arith.constant 0 : i32
    %c0_i32_1 = arith.constant 0 : i32
    return %c0_i32, %c0_i32_0 : i32, i32
  }
  func.func @transform_4(%arg0: i32) -> (i32, i32) {
    %c0_i32 = arith.constant 0 : i32
    %c0_i32_0 = arith.constant 0 : i32
    %c0_i32_1 = arith.constant 0 : i32
    return %c0_i32, %c0_i32_0 : i32, i32
  }
  func.func @transform_5(%arg0: i32) -> (i32, i32) {
    %c0_i32 = arith.constant 0 : i32
    %c0_i32_0 = arith.constant 0 : i32
    return %c0_i32, %arg0 : i32, i32
  }
}

</mosaic_0001>

<bundles_post_ra>
// kernel: _lambda_.1
= control target key start
LH: loop header
LB: loop body
LE: loop exit
PB: predicated region body
PF: predicated region fallthrough
CT: control target
= control target key end

     0   :  { %10 = vsyncpa [#allocation3], 0  ;;  %s1458_s0 = inlined_call_operand.vmem [shape: f32[32,128], index: 0, kind: input, shape index: {}]   ;;  %s1459_s1 = inlined_call_operand.hbm [shape: f32[120,32], index: 1, kind: input, shape index: {}]   ;;  %s1460_s2 = inlined_call_operand.hbm [shape: f32[120,1], index: 2, kind: input, shape index: {}]   ;;  %s1461_s3 = inlined_call_operand.hbm [shape: f32[128,40], index: 3, kind: input, shape index: {}]   ;;  %s1462_s4 = inlined_call_operand.vmem [shape: f32[128,1], index: 4, kind: input, shape index: {}]   ;;  %s1463_s5 = inlined_call_operand.vmem [shape: f32[128,128], index: 5, kind: output, shape index: {}]  }
   0x1   :  { %11 = vsyncpa [#allocation5], 0  ;;  %s31_s20 = sshll.u32 %s1460_s2, 4  ;;  %s1062_s21 = smov [#allocation4]   ;;  %s32_s20 = int_to_ptr.hbm [resolvable:$true] %s31_s20 }
   0x2   :  { %s33_s22 = sshll.u32 %s1062_s21, 4  ;;  %s18_s25 = sshll.u32 %s1459_s1, 4  ;;  %s34_s22 = int_to_ptr.vmem [resolvable:$true] %s33_s22  ;;  %s19_s25 = int_to_ptr.hbm [resolvable:$true] %s18_s25 }
   0x3   :  { %s1063_s26 = smov 128   ;;  %s1064_s27 = smov 8  }
   0x4   :  { %39 = dma.hbm_to_vmem [thread:$0]  %s32_s20, 1920, %s34_s22, [#allocation5], %s1063_s26, %s1063_s26, %s1064_s27  }
   0x5   :  { %s1065_s28 = smov [#allocation2]   ;;  %s44_s7 = sshll.u32 %s1461_s3, 4  ;;  %s45_s7 = int_to_ptr.hbm [resolvable:$true] %s44_s7 }
   0x6   :  { %s20_s29 = sshll.u32 %s1065_s28, 4  ;;  %s1066_s2 = smov [#allocation6]   ;;  %s21_s29 = int_to_ptr.vmem [resolvable:$true] %s20_s29 }
   0x7   :  { %26 = dma.hbm_to_vmem [thread:$0]  %s19_s25, 1920, %s21_s29, [#allocation3], %s1063_s26, %s1063_s26, %s1064_s27  }
   0x8   :  { %s46_s8 = sshll.u32 %s1066_s2, 4  ;;  %s47_s8 = int_to_ptr.vmem [resolvable:$true] %s46_s8 }
   0x9   :  { %52 = dma.hbm_to_vmem [thread:$0]  %s45_s7, 2048, %s47_s8, [#allocation5], %s1063_s26, %s1063_s26, %s1064_s27  }
   0xa   :  { %1058 = dma.done.wait [#allocation3], 1920  }
   0xb   :  { %1059 = vsyncadd [#allocation3], 4294965376 }
   0xc   :  { %1060 = dma.done.wait [#allocation5], 3968  }
   0xd   :  { %1061 = vsyncadd [#allocation5], 4294963328  ;;  %v1067_v0 = vmov 0   ;;  %v92_v1 = vld [vmem:[#allocation4 + $0x30] sm:$0xff]  ;;  %v90_v2 = vld [vmem:[#allocation4 + $0x20] sm:$0xff]  ;;  %vm176_vm0 = vcmask 261120  }
   0xe   :  { %924 = vset.pattern.permute.xlu1 %v1067_v0  ;;  %923 = vset.pattern.permute.xlu0 %v1067_v0  ;;  %v70_v3 = vld [vmem:[%s1458_s0 + $0x18] sm:$0xff]  ;;  %v69_v4 = vld [vmem:[%s1458_s0 + $0x10] sm:$0xff]  ;;  %v68_v5 = vld [vmem:[%s1458_s0 + $0x8] sm:$0xff]  ;;  %vm741_vm1 = vcmask 326656  }
   0xf   :  { %925 = vset.pattern.permute.xlu2 %v1067_v0  ;;  %133 = vperm.xlu1 %924, %v92_v1   ;;  %v93_v6 = vld [vmem:[#allocation4 + $0x38] sm:$0xff]  ;;  %v67_v7 = vld [vmem:[%s1458_s0] sm:$0xff]  ;;  %v88_v12 = vld [vmem:[#allocation4 + $0x10] sm:$0xff] }
  0x10   :  { %123 = vperm.xlu0 %923, %v90_v2   ;;  %234 = vmatpush.msra.mxu0 %v70_v3  ;;  %v71_v8 = vld [vmem:[#allocation2] sm:$0xff]  ;;  %v89_v11 = vld [vmem:[#allocation4 + $0x18] sm:$0xff]  ;;  %v72_v13 = vld [vmem:[#allocation2 + $0x8] sm:$0xff] }
  0x11   :  { %908 = vmatpush.msra.mxu3 %v70_v3  ;;  %138 = vperm.xlu2 %925, %v93_v6   ;;  %v79_v9 = vld [vmem:[#allocation2 + $0x40] sm:$0xff]  ;;  %v80_v14 = vld [vmem:[#allocation2 + $0x48] sm:$0xff]  ;;  %v94_v15 = vld [vmem:[#allocation4 + $0x40] sm:$0xff] }
  0x12   :  { %235 = vmatpush.msra.mxu0 %v69_v4  ;;  %v91_v10 = vld [vmem:[#allocation4 + $0x28] sm:$0xff]  ;;  %v73_v18 = vld [vmem:[#allocation2 + $0x10] sm:$0xff]  ;;  %v96_v20 = vld [vmem:[#allocation4 + $0x50] sm:$0xff] }
  0x13   :  { %909 = vmatpush.msra.mxu3 %v69_v4  ;;  %v87_v16 = vld [vmem:[#allocation4 + $0x8] sm:$0xff]  ;;  %v81_v19 = vld [vmem:[#allocation2 + $0x50] sm:$0xff]  ;;  %v86_v21 = vld [vmem:[#allocation4] sm:$0xff] }
  0x14   :  { %236 = vmatpush.msra.mxu0 %v68_v5  ;;  %v95_v17 = vld [vmem:[#allocation4 + $0x48] sm:$0xff]  ;;  %v97_v22 = vld [vmem:[#allocation4 + $0x58] sm:$0xff]  ;;  %v74_v23 = vld [vmem:[#allocation2 + $0x18] sm:$0xff] }
  0x15   :  { %910 = vmatpush.msra.mxu3 %v68_v5  ;;  %v82_v24 = vld [vmem:[#allocation2 + $0x58] sm:$0xff]  ;;  %v99_v25 = vld [vmem:[#allocation4 + $0x68] sm:$0xff]  ;;  %v100_v27 = vld [vmem:[#allocation4 + $0x70] sm:$0xff] }
  0x16   :  { %237 = vmatpush.msra.mxu0 %v67_v7  ;;  %v98_v26 = vld [vmem:[#allocation4 + $0x60] sm:$0xff]  ;;  %v75_v28 = vld [vmem:[#allocation2 + $0x20] sm:$0xff]  ;;  %v646_v30 = vld [vmem:[%s1462_s4 + $0x8] sm:$0xff] }
  0x17   :  { %911 = vmatpush.msra.mxu3 %v67_v7  ;;  %877 = vmatmul.msk.f32.vlgmr.msra.gmra.mxu0 %vm176_vm0, %v71_v8  ;;  %v83_v29 = vld [vmem:[#allocation2 + $0x60] sm:$0xff]  ;;  %v647_v32 = vld [vmem:[%s1462_s4 + $0x10] sm:$0xff]  ;;  %v76_v33 = vld [vmem:[#allocation2 + $0x28] sm:$0xff] }
  0x18   :  { %885 = vmatmul.msk.f32.vlgmr.msra.gmra.mxu3 %vm176_vm0, %v79_v9  ;;  %128 = vperm.xlu0 %923, %v91_v10   ;;  %v645_v31 = vld [vmem:[%s1462_s4] sm:$0xff]  ;;  %v84_v34 = vld [vmem:[#allocation2 + $0x68] sm:$0xff]  ;;  %v648_v36 = vld [vmem:[%s1462_s4 + $0x18] sm:$0xff] }
  0x19   :  { %118 = vperm.xlu1 %924, %v89_v11   ;;  %113 = vperm.xlu2 %925, %v88_v12   ;;  %v649_v35 = vld [vmem:[%s1462_s4 + $0x20] sm:$0xff]  ;;  %v650_v37 = vld [vmem:[%s1462_s4 + $0x28] sm:$0xff]  ;;  %v77_v38 = vld [vmem:[#allocation2 + $0x30] sm:$0xff] }
  0x1a   :  { %v85_v39 = vld [vmem:[#allocation2 + $0x70] sm:$0xff]  ;;  %v652_v40 = vld [vmem:[%s1462_s4 + $0x38] sm:$0xff]  ;;  %v653_v42 = vld [vmem:[%s1462_s4 + $0x40] sm:$0xff] }
  0x1b   :  { %v651_v41 = vld [vmem:[%s1462_s4 + $0x30] sm:$0xff]  ;;  %v78_v43 = vld [vmem:[#allocation2 + $0x38] sm:$0xff]  ;;  %v654_v45 = vld [vmem:[%s1462_s4 + $0x48] sm:$0xff] }
  0x1c   :  { %v655_v44 = vld [vmem:[%s1462_s4 + $0x50] sm:$0xff]  ;;  %v656_v46 = vld [vmem:[%s1462_s4 + $0x58] sm:$0xff]  ;;  %v658_v47 = vld [vmem:[%s1462_s4 + $0x68] sm:$0xff] }
  0x1d   :  { %v657_v48 = vld [vmem:[%s1462_s4 + $0x60] sm:$0xff]  ;;  %v659_v49 = vld [vmem:[%s1462_s4 + $0x70] sm:$0xff]  ;;  %v660_v50 = vld [vmem:[%s1462_s4 + $0x78] sm:$0xff] }
  0x1f   :  { %878 = vmatmul.msk.f32.gmra.mxu0 %vm176_vm0, %v72_v13 }
  0x20   :  { %886 = vmatmul.msk.f32.gmra.mxu3 %vm176_vm0, %v80_v14  ;;  %143 = vperm.xlu0 %923, %v94_v15  }
  0x21   :  { %108 = vperm.xlu1 %924, %v87_v16   ;;  %148 = vperm.xlu2 %925, %v95_v17  }
  0x27   :  { %879 = vmatmul.msk.f32.gmra.mxu0 %vm176_vm0, %v73_v18 }
  0x28   :  { %887 = vmatmul.msk.f32.gmra.mxu3 %vm176_vm0, %v81_v19  ;;  %103 = vperm.xlu0 %923, %v86_v21  }
  0x29   :  { %153 = vperm.xlu1 %924, %v96_v20   ;;  %158 = vperm.xlu2 %925, %v97_v22  }
  0x2f   :  { %880 = vmatmul.msk.f32.gmra.mxu0 %vm176_vm0, %v74_v23 }
  0x30   :  { %888 = vmatmul.msk.f32.gmra.mxu3 %vm176_vm0, %v82_v24  ;;  %163 = vperm.xlu0 %923, %v98_v26  }
  0x31   :  { %168 = vperm.xlu1 %924, %v99_v25   ;;  %173 = vperm.xlu2 %925, %v100_v27  }
  0x37   :  { %881 = vmatmul.msk.f32.gmra.mxu0 %vm176_vm0, %v75_v28 }
  0x38   :  { %889 = vmatmul.msk.f32.gmra.mxu3 %vm176_vm0, %v83_v29  ;;  %663 = vperm.xlu0 %923, %v645_v31  }
  0x39   :  { %668 = vperm.xlu1 %924, %v646_v30   ;;  %673 = vperm.xlu2 %925, %v647_v32  }
  0x3f   :  { %882 = vmatmul.msk.f32.gmra.mxu0 %vm176_vm0, %v76_v33 }
  0x40   :  { %890 = vmatmul.msk.f32.gmra.mxu3 %vm176_vm0, %v84_v34  ;;  %678 = vperm.xlu0 %923, %v648_v36  }
  0x41   :  { %683 = vperm.xlu1 %924, %v649_v35   ;;  %688 = vperm.xlu2 %925, %v650_v37  }
  0x47   :  { %883 = vmatmul.msk.f32.gmra.mxu0 %vm176_vm0, %v77_v38 }
  0x48   :  { %891 = vmatmul.msk.f32.gmra.mxu3 %vm176_vm0, %v85_v39  ;;  %693 = vperm.xlu0 %923, %v651_v41  }
  0x49   :  { %698 = vperm.xlu1 %924, %v652_v40   ;;  %703 = vperm.xlu2 %925, %v653_v42  }
  0x4f   :  { %884 = vmatmul.msk.f32.gmra.mxu0 %vm176_vm0, %v78_v43 }
  0x50   :  { %708 = vperm.xlu0 %923, %v654_v45  }
  0x51   :  { %713 = vperm.xlu1 %924, %v655_v44   ;;  %718 = vperm.xlu2 %925, %v656_v46  }
  0x58   :  { %723 = vperm.xlu0 %923, %v657_v48  }
  0x59   :  { %728 = vperm.xlu1 %924, %v658_v47   ;;  %733 = vperm.xlu2 %925, %v659_v49  }
  0x60   :  { %738 = vperm.xlu0 %923, %v660_v50  }
  0x6b   :  { %v1184_v55 = vpop.permute.xlu2 %138 }
  0x73   :  { %v114_v60 = vpop.permute.xlu2 %113 }
  0x7b   :  { %v149_v6 = vpop.permute.xlu2 %148 }
  0x81   :  { %v1182_v54 = vpop.permute.xlu1 %133 }
  0x82   :  { %v124_v51 = vpop.permute.xlu0 %123 }
  0x8a   :  { %v129_v52 = vpop.permute.xlu0 %128 }
  0x8b   :  { %v119_v58 = vpop.permute.xlu1 %118 }
  0x92   :  { %v144_v56 = vpop.permute.xlu0 %143 }
  0x93   :  { %v109_v1 = vpop.permute.xlu1 %108 }
  0x94   :  { %v239_v53 = vpop.f32.mrf.mxu0 }
  0x9a   :  { %v104_v61 = vpop.permute.xlu0 %103 }
  0x9b   :  { %v263_v59 = vpop.f32.mrf.mxu3  ;;  %v1186_v63 = vadd.f32 %v239_v53, %v104_v61 }
  0x9c   :  { %v242_v57 = vpop.f32.mrf.mxu0  ;;  %v264_v0 = vadd.f32 %v263_v59, %v144_v56 }
  0x9d   :  { %v1189_v3 = vadd.f32 %v242_v57, %v109_v1 }
  0x9e   :  { %v305_v2 = vmul.f32 %v264_v0, %v1186_v63 }
  0x9f   :  { %v374_v10 = vmul.f32 %v264_v0, %v1189_v3 }
  0xa0   :  { %v306_v9 = vrot.slane %v305_v2, 4 }
  0xa1   :  { %v375_v16 = vrot.slane %v374_v10, 4 }
  0xa2   :  { %v307_v15 = vadd.f32 %v306_v9, %v305_v2 }
  0xa3   :  { %v266_v4 = vpop.f32.mrf.mxu3  ;;  %v376_v25 = vadd.f32 %v375_v16, %v374_v10 }
  0xa4   :  { %v245_v62 = vpop.f32.mrf.mxu0  ;;  %v267_v8 = vadd.f32 %v266_v4, %v149_v6  ;;  %v308_v24 = vrot.slane %v307_v15, 2 }
  0xa5   :  { %v1191_v7 = vadd.f32 %v245_v62, %v114_v60  ;;  %v377_v35 = vrot.slane %v376_v25, 2 }
  0xa6   :  { %v381_v12 = vmul.f32 %v267_v8, %v1189_v3  ;;  %v312_v17 = vmul.f32 %v267_v8, %v1186_v63  ;;  %v309_v34 = vadd.f32 %v308_v24, %v307_v15 }
  0xa7   :  { %v443_v11 = vmul.f32 %v264_v0, %v1191_v7  ;;  %v450_v13 = vmul.f32 %v267_v8, %v1191_v7  ;;  %v1206_v47 = vadd.f32 %v377_v35, %v376_v25 }
  0xa8   :  { %v382_v21 = vrot.slane %v381_v12, 4  ;;  %v313_v27 = vrot.slane %v312_v17, 4  ;;  %v310_v46 = vrot.slane %v309_v34, 1 }
  0xa9   :  { %v444_v19 = vrot.slane %v443_v11, 4  ;;  %v451_v22 = vrot.slane %v450_v13, 4 }
  0xaa   :  { %v383_v31 = vadd.f32 %v382_v21, %v381_v12  ;;  %v314_v37 = vadd.f32 %v313_v27, %v312_v17 }
  0xab   :  { %v445_v30 = vadd.f32 %v444_v19, %v443_v11  ;;  %v452_v32 = vadd.f32 %v451_v22, %v450_v13  ;;  %v1224_v17 = vpop.f32.mrf.mxu3 }
  0xac   :  { %v248_v5 = vpop.f32.mrf.mxu0  ;;  %v384_v43 = vrot.slane %v383_v31, 2  ;;  %v315_v49 = vrot.slane %v314_v37, 2 }
  0xad   :  { %v1197_v14 = vadd.f32 %v248_v5, %v119_v58  ;;  %v446_v41 = vrot.slane %v445_v30, 2  ;;  %v453_v44 = vrot.slane %v452_v32, 2 }
  0xae   :  { %v1209_v57 = vadd.f32 %v384_v43, %v383_v31  ;;  %v1216_v1 = vadd.f32 %v315_v49, %v314_v37 }
  0xaf   :  { %v512_v23 = vmul.f32 %v264_v0, %v1197_v14  ;;  %v519_v26 = vmul.f32 %v267_v8, %v1197_v14  ;;  %v447_v53 = vadd.f32 %v446_v41, %v445_v30  ;;  %v454_v58 = vadd.f32 %v453_v44, %v452_v32 }
  0xb0   :  { %v386_v16 = vrot.slane %v1209_v57, 1 }
  0xb1   :  { %v513_v33 = vrot.slane %v512_v23, 4  ;;  %v520_v36 = vrot.slane %v519_v26, 4  ;;  %v455_v15 = vrot.slane %v454_v58, 1 }
  0xb3   :  { %v514_v45 = vadd.f32 %v513_v33, %v512_v23  ;;  %v521_v48 = vadd.f32 %v520_v36, %v519_v26  ;;  %v1238_v33 = vadd.f32 %v455_v15, %v454_v58 }
  0xb4   :  { %v251_v18 = vpop.f32.mrf.mxu0 }
  0xb5   :  { %v1200_v20 = vadd.f32 %v251_v18, %v124_v51  ;;  %v515_v59 = vrot.slane %v514_v45, 2  ;;  %v522_v61 = vrot.slane %v521_v48, 2 }
  0xb7   :  { %v581_v28 = vmul.f32 %v264_v0, %v1200_v20  ;;  %v588_v29 = vmul.f32 %v267_v8, %v1200_v20  ;;  %v1214_v0 = vadd.f32 %v310_v46, %v309_v34  ;;  %v448_v8 = vrot.slane %v447_v53, 1 }
  0xb8   :  { %v1221_v12 = vadd.f32 %v515_v59, %v514_v45  ;;  %v1226_v18 = vadd.f32 %v522_v61, %v521_v48 }
  0xb9   :  { %v582_v38 = vrot.slane %v581_v28, 4  ;;  %v589_v39 = vrot.slane %v588_v29, 4 }
  0xba   :  { %v517_v34 = vrot.slane %v1221_v12, 1  ;;  %v524_v37 = vrot.slane %v1226_v18, 1 }
  0xbb   :  { %v583_v50 = vadd.f32 %v582_v38, %v581_v28  ;;  %v590_v51 = vadd.f32 %v589_v39, %v588_v29  ;;  %v1235_v28 = vadd.f32 %v448_v8, %v447_v53  ;;  %v317_v29 = vrot.slane %v1216_v1, 1 }
  0xbc   :  { %v254_v40 = vpop.f32.mrf.mxu0 }
  0xbd   :  { %v255_v42 = vadd.f32 %v254_v40, %v129_v52  ;;  %v379_v52 = vrot.slane %v1206_v47, 1  ;;  %v584_v2 = vrot.slane %v583_v50, 2  ;;  %v591_v4 = vrot.slane %v590_v51, 2 }
  0xbf   :  { %v422_v56 = vmul.f32 %v255_v42, %v1191_v7  ;;  %v284_v60 = vmul.f32 %v255_v42, %v1186_v63  ;;  %v353_v62 = vmul.f32 %v255_v42, %v1189_v3  ;;  %v491_v5 = vmul.f32 %v255_v42, %v1197_v14 }
  0xc0   :  { %v560_v10 = vmul.f32 %v255_v42, %v1200_v20  ;;  %v1230_v23 = vadd.f32 %v584_v2, %v583_v50  ;;  %v1232_v24 = vadd.f32 %v591_v4, %v590_v51  ;;  %v1250_v4 = vpop.f32.mrf.mxu3 }
  0xc1   :  { %v423_v9 = vrot.slane %v422_v56, 4  ;;  %v285_v13 = vrot.slane %v284_v60, 4  ;;  %v354_v19 = vrot.slane %v353_v62, 4 }
  0xc2   :  { %v561_v27 = vrot.slane %v560_v10, 4  ;;  %v586_v38 = vrot.slane %v1230_v23, 1  ;;  %v593_v42 = vrot.slane %v1232_v24, 1 }
  0xc3   :  { %v424_v26 = vadd.f32 %v423_v9, %v422_v56  ;;  %v286_v30 = vadd.f32 %v285_v13, %v284_v60  ;;  %v355_v35 = vadd.f32 %v354_v19, %v353_v62 }
  0xc4   :  { %v257_v6 = vpop.f32.mrf.mxu0  ;;  %v562_v44 = vadd.f32 %v561_v27, %v560_v10 }
  0xc5   :  { %v258_v11 = vadd.f32 %v257_v6, %v1182_v54  ;;  %v492_v54 = vrot.slane %v491_v5, 4  ;;  %v425_v43 = vrot.slane %v424_v26, 2  ;;  %v287_v48 = vrot.slane %v286_v30, 2 }
  0xc6   :  { %v356_v53 = vrot.slane %v355_v35, 2  ;;  %v563_v15 = vrot.slane %v562_v44, 2 }
  0xc7   :  { %v291_v21 = vmul.f32 %v258_v11, %v1186_v63  ;;  %v360_v22 = vmul.f32 %v258_v11, %v1189_v3  ;;  %v429_v25 = vmul.f32 %v258_v11, %v1191_v7  ;;  %v493_v39 = vadd.f32 %v492_v54, %v491_v5 }
  0xc8   :  { %v498_v45 = vmul.f32 %v258_v11, %v1197_v14  ;;  %v567_v46 = vmul.f32 %v258_v11, %v1200_v20  ;;  %v426_v5 = vadd.f32 %v425_v43, %v424_v26  ;;  %v288_v27 = vadd.f32 %v287_v48, %v286_v30 }
  0xc9   :  { %v361_v31 = vrot.slane %v360_v22, 4  ;;  %v430_v32 = vrot.slane %v429_v25, 4  ;;  %v292_v36 = vrot.slane %v291_v21, 4  ;;  %v494_v6 = vrot.slane %v493_v39, 2 }
  0xca   :  { %v499_v58 = vrot.slane %v498_v45, 4  ;;  %v568_v59 = vrot.slane %v567_v46, 4  ;;  %v564_v30 = vadd.f32 %v563_v15, %v562_v44 }
  0xcb   :  { %v431_v40 = vadd.f32 %v430_v32, %v429_v25  ;;  %v362_v49 = vadd.f32 %v361_v31, %v360_v22  ;;  %v293_v56 = vadd.f32 %v292_v36, %v291_v21  ;;  %v427_v31 = vrot.slane %v426_v5, 1 }
  0xcc   :  { %v260_v41 = vpop.f32.mrf.mxu0  ;;  %v500_v8 = vadd.f32 %v499_v58, %v498_v45  ;;  %v569_v9 = vadd.f32 %v568_v59, %v567_v46  ;;  %v495_v32 = vadd.f32 %v494_v6, %v493_v39 }
  0xcd   :  { %v432_v50 = vrot.slane %v431_v40, 2  ;;  %v261_v51 = vadd.f32 %v260_v41, %v1184_v55  ;;  %v363_v10 = vrot.slane %v362_v49, 2  ;;  %v294_v19 = vrot.slane %v293_v56, 2 }
  0xce   :  { %v501_v21 = vrot.slane %v500_v8, 2  ;;  %v570_v22 = vrot.slane %v569_v9, 2  ;;  %v428_v39 = vadd.f32 %v427_v31, %v426_v5 }
  0xcf   :  { %v433_v60 = vadd.f32 %v432_v50, %v431_v40  ;;  %v298_v61 = vmul.f32 %v261_v51, %v1186_v63  ;;  %v367_v62 = vmul.f32 %v261_v51, %v1189_v3  ;;  %v436_v2 = vmul.f32 %v261_v51, %v1191_v7 }
  0xd0   :  { %v357_v7 = vadd.f32 %v356_v53, %v355_v35  ;;  %v364_v26 = vadd.f32 %v363_v10, %v362_v49  ;;  %v502_v43 = vadd.f32 %v501_v21, %v500_v8  ;;  %v571_v45 = vadd.f32 %v570_v22, %v569_v9  ;;  %v1256_v10 = vpop.f32.mrf.mxu3 }
  0xd1   :  { %v299_v11 = vrot.slane %v298_v61, 4  ;;  %v368_v55 = vrot.slane %v367_v62, 4  ;;  %v437_v13 = vrot.slane %v436_v2, 4  ;;  %v434_v54 = vrot.slane %v433_v60, 1 }
  0xd2   :  { %v505_v46 = vmul.f32 %v261_v51, %v1197_v14  ;;  %v574_v50 = vmul.f32 %v261_v51, %v1200_v20  ;;  %v295_v58 = vadd.f32 %v294_v19, %v293_v56  ;;  %v365_v49 = vrot.slane %v364_v26, 1 }
  0xd3   :  { %v300_v63 = vadd.f32 %v299_v11, %v298_v61  ;;  %v369_v25 = vadd.f32 %v368_v55, %v367_v62  ;;  %v438_v3 = vadd.f32 %v437_v13, %v436_v2  ;;  %v1254_v59 = vadd.f32 %v434_v54, %v433_v60 }
  0xd4   :  { %v358_v2 = vrot.slane %v357_v7, 1  ;;  %v506_v35 = vrot.slane %v505_v46, 4  ;;  %v575_v48 = vrot.slane %v574_v50, 4  ;;  %v503_v8 = vrot.slane %v502_v43, 1 }
  0xd5   :  { %v301_v36 = vrot.slane %v300_v63, 2  ;;  %v370_v40 = vrot.slane %v369_v25, 2  ;;  %v439_v41 = vrot.slane %v438_v3, 2  ;;  %v572_v9 = vrot.slane %v571_v45, 1 }
  0xd6   :  { %v507_v14 = vadd.f32 %v506_v35, %v505_v46  ;;  %v576_v11 = vadd.f32 %v575_v48, %v574_v50  ;;  %v296_v20 = vrot.slane %v295_v58, 1  ;;  %v457_v51 = vmax.f32 %v428_v39, %v1254_v59 }
  0xd7   :  { %v371_v61 = vadd.f32 %v370_v40, %v369_v25  ;;  %v440_v62 = vadd.f32 %v439_v41, %v438_v3  ;;  %v302_v53 = vadd.f32 %v301_v36, %v300_v63  ;;  %v496_v55 = vrot.slane %v495_v32, 1 }
  0xd8   :  { %v565_v13 = vrot.slane %v564_v30, 1  ;;  %v508_v44 = vrot.slane %v507_v14, 2  ;;  %v577_v15 = vrot.slane %v576_v11, 2  ;;  %v289_v19 = vrot.slane %v288_v27, 1 }
  0xd9   :  { %v441_v6 = vrot.slane %v440_v62, 1  ;;  %v372_v56 = vrot.slane %v371_v61, 1  ;;  %v1259_v5 = vadd.f32 %v365_v49, %v364_v26  ;;  %v303_v21 = vrot.slane %v302_v53, 1 }
  0xda   :  { %v1261_v54 = vadd.f32 %v503_v8, %v502_v43  ;;  %v573_v63 = vadd.f32 %v572_v9, %v571_v45  ;;  %v509_v25 = vadd.f32 %v508_v44, %v507_v14  ;;  %v578_v3 = vadd.f32 %v577_v15, %v576_v11  ;;  %v154_v11 = vpop.permute.xlu1 %153 }
  0xdb   :  { %v442_v60 = vadd.f32 %v441_v6, %v440_v62  ;;  %v1263_v31 = vadd.f32 %v358_v2, %v357_v7  ;;  %v1265_v36 = vadd.f32 %v296_v20, %v295_v58  ;;  %v1267_v40 = vadd.f32 %v372_v56, %v371_v61  ;;  %v159_v56 = vpop.permute.xlu2 %158 }
  0xdc   :  { %v1270_v46 = vadd.f32 %v496_v55, %v495_v32  ;;  %v566_v50 = vadd.f32 %v565_v13, %v564_v30  ;;  %v510_v26 = vrot.slane %v509_v25, 1  ;;  %v579_v62 = vrot.slane %v578_v3, 1  ;;  %v164_v13 = vpop.permute.xlu0 %163 }
  0xdd   :  { %v458_v22 = vmax.f32 %v457_v51, %v442_v60  ;;  %v1272_v35 = vadd.f32 %v289_v19, %v288_v27  ;;  %v388_v43 = vmax.f32 %v1263_v31, %v1259_v5  ;;  %v1276_v45 = vadd.f32 %v303_v21, %v302_v53  ;;  %v278_v53 = vpop.f32.mrf.mxu3 }
  0xde   :  { %v526_v58 = vmax.f32 %v1270_v46, %v1261_v54  ;;  %v595_v61 = vmax.f32 %v566_v50, %v573_v63  ;;  %v1283_v2 = vadd.f32 %v510_v26, %v509_v25  ;;  %v580_v32 = vadd.f32 %v579_v62, %v578_v3 }
  0xdf   :  { %v459_v41 = vmax.f32 %v458_v22, %v1235_v28  ;;  %v319_v30 = vmax.f32 %v1272_v35, %v1265_v36  ;;  %v389_v27 = vmax.f32 %v388_v43, %v1267_v40  ;;  %v587_v9 = vadd.f32 %v586_v38, %v1230_v23 }
  0xe0   :  { %v527_v6 = vmax.f32 %v526_v58, %v1283_v2  ;;  %v596_v8 = vmax.f32 %v595_v61, %v580_v32  ;;  %v518_v14 = vadd.f32 %v517_v34, %v1221_v12  ;;  %v594_v23 = vadd.f32 %v593_v42, %v1232_v24 }
  0xe1   :  { %v1279_v7 = vmax.f32 %v459_v41, %v1238_v33  ;;  %v320_v20 = vmax.f32 %v319_v30, %v1276_v45  ;;  %v525_v12 = vadd.f32 %v524_v37, %v1226_v18  ;;  %v1312_v55 = vadd.f32 %v1224_v17, %v154_v11 }
  0xe2   :  { %v597_v38 = vmax.f32 %v596_v8, %v587_v9  ;;  %v528_v34 = vmax.f32 %v527_v6, %v518_v14  ;;  %v1321_v24 = vadd.f32 %v1250_v4, %v159_v56  ;;  %v1326_v18 = vadd.f32 %v317_v29, %v1216_v1  ;;  %v169_v61 = vpop.permute.xlu1 %168 }
  0xe3   :  { %v461_v48 = vsub.f32 %v428_v39, %v1279_v7  ;;  %v464_v49 = vsub.f32 %v1254_v59, %v1279_v7  ;;  %v467_v39 = vsub.f32 %v442_v60, %v1279_v7  ;;  %v1303_v59 = vadd.f32 %v379_v52, %v1206_v47 }
  0xe4   :  { %v1317_v47 = vadd.f32 %v386_v16, %v1209_v57  ;;  %v598_v42 = vmax.f32 %v597_v38, %v594_v23  ;;  %v529_v44 = vmax.f32 %v528_v34, %v525_v12  ;;  %v1329_v17 = vadd.f32 %v1256_v10, %v164_v13 }
  0xe5   :  { %v462_v51 = vmul.f32 1.442695, %v461_v48  ;;  %v465_v60 = vmul.f32 1.442695, %v464_v49  ;;  %v390_v52 = vmax.f32 %v389_v27, %v1303_v59  ;;  %v468_v37 = vmul.f32 1.442695, %v467_v39 }
  0xe6   :  { %v321_v57 = vmax.f32 %v320_v20, %v1214_v0  ;;  %v599_v16 = vsub.f32 %v566_v50, %v598_v42  ;;  %v602_v15 = vsub.f32 %v573_v63, %v598_v42  ;;  %v605_v19 = vsub.f32 %v580_v32, %v598_v42  ;;  %v281_v50 = vpop.f32.mrf.mxu3 }
  0xe7   :  { %926 = vpow2.f32 %v462_v51  ;;  %v608_v21 = vsub.f32 %v587_v9, %v598_v42  ;;  %v611_v4 = vsub.f32 %v594_v23, %v598_v42  ;;  %v530_v22 = vsub.f32 %v1270_v46, %v529_v44 }
  0xe8   :  { %928 = vpow2.f32 %v465_v60  ;;  %v1334_v25 = vmax.f32 %v390_v52, %v1317_v47  ;;  %v600_v1 = vmul.f32 1.442695, %v599_v16  ;;  %v603_v29 = vmul.f32 1.442695, %v602_v15 }
  0xe9   :  { %v606_v3 = vmul.f32 1.442695, %v605_v19  ;;  %v533_v10 = vsub.f32 %v1261_v54, %v529_v44  ;;  %v609_v41 = vmul.f32 1.442695, %v608_v21  ;;  %v536_v26 = vsub.f32 %v1283_v2, %v529_v44  ;;  %v174_v2 = vpop.permute.xlu2 %173 }
  0xea   :  { %930 = vpow2.f32 %v468_v37  ;;  %v470_v63 = vsub.f32 %v1235_v28, %v1279_v7  ;;  %v612_v62 = vmul.f32 1.442695, %v611_v4  ;;  %v539_v46 = vsub.f32 %v518_v14, %v529_v44 }
  0xeb   :  { %932 = vpow2.f32 %v600_v1  ;;  %v473_v43 = vsub.f32 %v1238_v33, %v1279_v7  ;;  %v531_v32 = vmul.f32 1.442695, %v530_v22  ;;  %v542_v30 = vsub.f32 %v525_v12, %v529_v44 }
  0xec   :  { %934 = vpow2.f32 %v603_v29  ;;  %v392_v54 = vsub.f32 %v1263_v31, %v1334_v25  ;;  %v1344_v27 = vadd.f32 %v278_v53, %v169_v61  ;;  %v534_v28 = vmul.f32 1.442695, %v533_v10 }
  0xed   :  { %v927_v58 = vpop.eup %926  ;;  %936 = vpow2.f32 %v606_v3  ;;  %v395_v48 = vsub.f32 %v1259_v5, %v1334_v25  ;;  %v1348_v6 = vadd.f32 %v281_v50, %v174_v2  ;;  %v537_v33 = vmul.f32 1.442695, %v536_v26 }
  0xee   :  { %v929_v49 = vpop.eup %928  ;;  %938 = vpow2.f32 %v609_v41  ;;  %v1351_v7 = vmax.f32 %v321_v57, %v1326_v18  ;;  %v540_v8 = vmul.f32 1.442695, %v539_v46  ;;  %v471_v9 = vmul.f32 1.442695, %v470_v63 }
  0xef   :  { %940 = vpow2.f32 %v612_v62  ;;  %v474_v31 = vmul.f32 1.442695, %v473_v43  ;;  %v543_v53 = vmul.f32 1.442695, %v542_v30  ;;  %v393_v11 = vmul.f32 1.442695, %v392_v54 }
  0xf0   :  { %v931_v14 = vpop.eup %930  ;;  %942 = vpow2.f32 %v531_v32  ;;  %v398_v20 = vsub.f32 %v1267_v40, %v1334_v25  ;;  %v396_v51 = vmul.f32 1.442695, %v395_v48  ;;  %v401_v39 = vsub.f32 %v1303_v59, %v1334_v25 }
  0xf1   :  { %v933_v5 = vpop.eup %932  ;;  %944 = vpow2.f32 %v534_v28  ;;  %v404_v56 = vsub.f32 %v1317_v47, %v1334_v25  ;;  %v476_v12 = vadd.f32 %v929_v49, %v927_v58  ;;  %v480_v34 = vmul.f32 %v927_v58, %v1312_v55 }
  0xf2   :  { %v935_v23 = vpop.eup %934  ;;  %v618_v38 = vmul.f32 %v933_v5, %v1312_v55  ;;  %946 = vpow2.f32 %v537_v33  ;;  %v481_v13 = vmul.f32 %v929_v49, %v1321_v24  ;;  %v483_v59 = vmul.f32 %v931_v14, %v1329_v17 }
  0xf3   :  { %v937_v60 = vpop.eup %936  ;;  %v614_v52 = vadd.f32 %v935_v23, %v933_v5  ;;  %v619_v40 = vmul.f32 %v935_v23, %v1321_v24  ;;  %948 = vpow2.f32 %v540_v8  ;;  %v399_v44 = vmul.f32 1.442695, %v398_v20 }
  0xf4   :  { %v939_v42 = vpop.eup %938  ;;  %950 = vpow2.f32 %v543_v53  ;;  %v323_v47 = vsub.f32 %v1272_v35, %v1351_v7  ;;  %v402_v15 = vmul.f32 1.442695, %v401_v39  ;;  %v621_v21 = vmul.f32 %v937_v60, %v1329_v17 }
  0xf5   :  { %v941_v37 = vpop.eup %940  ;;  %v615_v57 = vadd.f32 %v937_v60, %v614_v52  ;;  %v620_v16 = vadd.f32 %v619_v40, %v618_v38  ;;  %952 = vpow2.f32 %v471_v9  ;;  %v477_v4 = vadd.f32 %v931_v14, %v476_v12 }
  0xf6   :  { %v943_v19 = vpop.eup %942  ;;  %954 = vpow2.f32 %v474_v31  ;;  %v405_v22 = vmul.f32 1.442695, %v404_v56  ;;  %v482_v3 = vadd.f32 %v481_v13, %v480_v34  ;;  %v326_v62 = vsub.f32 %v1265_v36, %v1351_v7 }
  0xf7   :  { %v945_v25 = vpop.eup %944  ;;  %v616_v1 = vadd.f32 %v939_v42, %v615_v57  ;;  %v549_v29 = vmul.f32 %v943_v19, %v1312_v55  ;;  %956 = vpow2.f32 %v393_v11  ;;  %v622_v41 = vadd.f32 %v621_v21, %v620_v16 }
  0xf8   :  { %v947_v10 = vpop.eup %946  ;;  %v545_v35 = vadd.f32 %v945_v25, %v943_v19  ;;  %v550_v26 = vmul.f32 %v945_v25, %v1321_v24  ;;  %958 = vpow2.f32 %v396_v51  ;;  %v329_v46 = vsub.f32 %v1276_v45, %v1351_v7 }
  0xf9   :  { %v949_v63 = vpop.eup %948  ;;  %v617_v50 = vadd.f32 %v941_v37, %v616_v1  ;;  %960 = vpow2.f32 %v399_v44  ;;  %v623_v58 = vmul.f32 %v939_v42, %v1344_v27  ;;  %v324_v30 = vmul.f32 1.442695, %v323_v47 }
  0xfa   :  { %v951_v43 = vpop.eup %950  ;;  %v546_v61 = vadd.f32 %v947_v10, %v545_v35  ;;  %v551_v32 = vadd.f32 %v550_v26, %v549_v29  ;;  %v552_v2 = vmul.f32 %v947_v10, %v1329_v17  ;;  %v484_v28 = vadd.f32 %v483_v59, %v482_v3 }
  0xfb   :  { %v953_v54 = vpop.eup %952  ;;  %962 = vrcp.f32 %v617_v50  ;;  %v332_v48 = vsub.f32 %v1214_v0, %v1351_v7  ;;  %v624_v33 = vadd.f32 %v623_v58, %v622_v41  ;;  %v625_v9 = vmul.f32 %v941_v37, %v1348_v6 }
  0xfc   :  { %v955_v49 = vpop.eup %954  ;;  %v547_v36 = vadd.f32 %v949_v63, %v546_v61  ;;  %v478_v8 = vadd.f32 %v953_v54, %v477_v4  ;;  %964 = vpow2.f32 %v402_v15  ;;  %v553_v31 = vadd.f32 %v552_v2, %v551_v32 }
  0xfd   :  { %v957_v45 = vpop.eup %956  ;;  %v327_v14 = vmul.f32 1.442695, %v326_v62  ;;  %v330_v53 = vmul.f32 1.442695, %v329_v46  ;;  %v554_v5 = vmul.f32 %v949_v63, %v1344_v27  ;;  %966 = vpow2.f32 %v405_v22 }
  0xfe   :  { %v959_v11 = vpop.eup %958  ;;  %v548_v20 = vadd.f32 %v951_v43, %v547_v36  ;;  %v479_v51 = vadd.f32 %v955_v49, %v478_v8  ;;  %v411_v0 = vmul.f32 %v957_v45, %v1312_v55  ;;  %968 = vpow2.f32 %v324_v30 }
  0xff   :  { %v961_v39 = vpop.eup %960  ;;  %v407_v56 = vadd.f32 %v959_v11, %v957_v45  ;;  %v412_v23 = vmul.f32 %v959_v11, %v1321_v24  ;;  %v626_v38 = vadd.f32 %v625_v9, %v624_v33  ;;  %v485_v12 = vmul.f32 %v953_v54, %v1344_v27  ;;  %v638_v11 = vld [vmem:[#allocation6 + $0x48] sm:$0xff] }
 0x100   :  { %970 = vrcp.f32 %v548_v20  ;;  %v335_v34 = vsub.f32 %v1326_v18, %v1351_v7  ;;  %v555_v52 = vadd.f32 %v554_v5, %v553_v31  ;;  %v414_v44 = vmul.f32 %v961_v39, %v1329_v17  ;;  %v632_v20 = vld [vmem:[#allocation6 + $0x18] sm:$0xff] }
 0x101   :  { %v963_v60 = vpop.eup %962  ;;  %972 = vrcp.f32 %v479_v51  ;;  %v408_v40 = vadd.f32 %v961_v39, %v407_v56  ;;  %v413_v13 = vadd.f32 %v412_v23, %v411_v0  ;;  %v333_v47 = vmul.f32 1.442695, %v332_v48  ;;  %v640_v5 = vld [vmem:[#allocation6 + $0x58] sm:$0xff]  ;;  %v633_v51 = vld [vmem:[#allocation6 + $0x20] sm:$0xff]  ;;  %v634_v56 = vld [vmem:[#allocation6 + $0x28] sm:$0xff] }
 0x102   :  { %v965_v42 = vpop.eup %964  ;;  %v628_v59 = vmul.f32 %v963_v60, %v626_v38  ;;  %974 = vpow2.f32 %v327_v14  ;;  %v556_v37 = vmul.f32 %v951_v43, %v1348_v6  ;;  %v486_v57 = vadd.f32 %v485_v12, %v484_v28  ;;  %v629_v14 = vld [vmem:[#allocation6] sm:$0xff]  ;;  %v642_v0 = vld [vmem:[#allocation6 + $0x68] sm:$0xff]  ;;  %v635_v23 = vld [vmem:[#allocation6 + $0x30] sm:$0xff]  ;;  %v664_v60 = vpop.permute.xlu0 %663 }
 0x103   :  { %v409_v16 = vadd.f32 %v965_v42, %v408_v40  ;;  %976 = vpow2.f32 %v330_v53  ;;  %v967_v15 = vpop.eup %966  ;;  %v415_v18 = vadd.f32 %v414_v44, %v413_v13  ;;  %v336_v7 = vmul.f32 1.442695, %v335_v34  ;;  %v630_v53 = vld [vmem:[#allocation6 + $0x8] sm:$0xff]  ;;  %v641_v39 = vld [vmem:[#allocation6 + $0x60] sm:$0xff]  ;;  %v643_v38 = vld [vmem:[#allocation6 + $0x70] sm:$0xff]  ;;  %v669_v40 = vpop.permute.xlu1 %668 }
 0x104   :  { %801 = vmatpush.msra.mxu1 %v628_v59  ;;  %912 = vmatpush.msra.mxu2 %v628_v59  ;;  %v969_v19 = vpop.eup %968  ;;  %v557_v21 = vadd.f32 %v556_v37, %v555_v52  ;;  %v487_v4 = vmul.f32 %v955_v49, %v1348_v6  ;;  %v416_v1 = vmul.f32 %v965_v42, %v1344_v27  ;;  %978 = vpow2.f32 %v333_v47  ;;  %v636_v12 = vld [vmem:[#allocation6 + $0x38] sm:$0xff]  ;;  %v674_v52 = vpop.permute.xlu2 %673 }
 0x105   :  { %v410_v22 = vadd.f32 %v967_v15, %v409_v16  ;;  %v342_v41 = vmul.f32 %v969_v19, %v1312_v55  ;;  %v418_v43 = vmul.f32 %v967_v15, %v1348_v6  ;;  %v644_v34 = vld [vmem:[#allocation6 + $0x78] sm:$0xff] }
 0x106   :  { %v971_v25 = vpop.eup %970  ;;  %v488_v10 = vadd.f32 %v487_v4, %v486_v57  ;;  %v417_v26 = vadd.f32 %v416_v1, %v415_v18 }
 0x107   :  { %v973_v29 = vpop.eup %972  ;;  %v559_v3 = vmul.f32 %v971_v25, %v557_v21  ;;  %980 = vrcp.f32 %v410_v22 }
 0x108   :  { %v975_v35 = vpop.eup %974  ;;  %982 = vpow2.f32 %v336_v7  ;;  %v490_v50 = vmul.f32 %v973_v29, %v488_v10  ;;  %v419_v30 = vadd.f32 %v418_v43, %v417_v26 }
 0x109   :  { %v977_v63 = vpop.eup %976  ;;  %802 = vmatpush.msra.mxu1 %v559_v3  ;;  %913 = vmatpush.msra.mxu2 %v559_v3  ;;  %v338_v62 = vadd.f32 %v975_v35, %v969_v19  ;;  %v343_v46 = vmul.f32 %v975_v35, %v1321_v24 }
 0x10a   :  { %v979_v32 = vpop.eup %978  ;;  %v345_v55 = vmul.f32 %v977_v63, %v1329_v17  ;;  %v637_v17 = vld [vmem:[#allocation6 + $0x40] sm:$0xff]  ;;  %v679_v13 = vpop.permute.xlu0 %678 }
 0x10b   :  { %803 = vmatpush.msra.mxu1 %v490_v50  ;;  %914 = vmatpush.msra.mxu2 %v490_v50  ;;  %v339_v58 = vadd.f32 %v977_v63, %v338_v62  ;;  %v344_v61 = vadd.f32 %v343_v46, %v342_v41  ;;  %v347_v24 = vmul.f32 %v979_v32, %v1344_v27  ;;  %v631_v27 = vld [vmem:[#allocation6 + $0x10] sm:$0xff]  ;;  %v684_v47 = vpop.permute.xlu1 %683 }
 0x10c   :  { %v689_v42 = vpop.permute.xlu2 %688 }
 0x10d   :  { %v981_v54 = vpop.eup %980  ;;  %v340_v2 = vadd.f32 %v979_v32, %v339_v58  ;;  %v346_v49 = vadd.f32 %v345_v55, %v344_v61 }
 0x10e   :  { %v983_v28 = vpop.eup %982  ;;  %v421_v48 = vmul.f32 %v981_v54, %v419_v30 }
 0x10f   :  { %v341_v33 = vadd.f32 %v983_v28, %v340_v2  ;;  %v348_v36 = vadd.f32 %v347_v24, %v346_v49  ;;  %v349_v8 = vmul.f32 %v983_v28, %v1348_v6  ;;  %v639_v6 = vld [vmem:[#allocation6 + $0x50] sm:$0xff] }
 0x110   :  { %804 = vmatpush.msra.mxu1 %v421_v48  ;;  %915 = vmatpush.msra.mxu2 %v421_v48 }
 0x111   :  { %984 = vrcp.f32 %v341_v33  ;;  %v350_v45 = vadd.f32 %v349_v8, %v348_v36 }
 0x112   :  { %v694_v37 = vpop.permute.xlu0 %693 }
 0x113   :  { %v699_v19 = vpop.permute.xlu1 %698 }
 0x114   :  { %v704_v57 = vpop.permute.xlu2 %703 }
 0x117   :  { %v985_v9 = vpop.eup %984 }
 0x118   :  { %v352_v31 = vmul.f32 %v985_v9, %v350_v45 }
 0x11a   :  { %805 = vmatpush.msra.mxu1 %v352_v31  ;;  %916 = vmatpush.msra.mxu2 %v352_v31  ;;  %v709_v21 = vpop.permute.xlu0 %708 }
 0x11b   :  { %892 = vmatmul.msk.f32.vlgmr.msra.gmra.mxu1 %vm741_vm1, %v629_v14  ;;  %900 = vmatmul.msk.f32.vlgmr.msra.gmra.mxu2 %vm741_vm1, %v637_v17  ;;  %v714_v29 = vpop.permute.xlu1 %713 }
 0x11c   :  { %v719_v26 = vpop.permute.xlu2 %718 }
 0x122   :  { %v724_v43 = vpop.permute.xlu0 %723 }
 0x123   :  { %893 = vmatmul.msk.f32.gmra.mxu1 %vm741_vm1, %v630_v53  ;;  %901 = vmatmul.msk.f32.gmra.mxu2 %vm741_vm1, %v638_v11  ;;  %v729_v55 = vpop.permute.xlu1 %728 }
 0x124   :  { %v734_v49 = vpop.permute.xlu2 %733 }
 0x12a   :  { %v739_v45 = vpop.permute.xlu0 %738 }
 0x12b   :  { %894 = vmatmul.msk.f32.gmra.mxu1 %vm741_vm1, %v631_v27  ;;  %902 = vmatmul.msk.f32.gmra.mxu2 %vm741_vm1, %v639_v6 }
 0x133   :  { %895 = vmatmul.msk.f32.gmra.mxu1 %vm741_vm1, %v632_v20  ;;  %903 = vmatmul.msk.f32.gmra.mxu2 %vm741_vm1, %v640_v5 }
 0x13b   :  { %896 = vmatmul.msk.f32.gmra.mxu1 %vm741_vm1, %v633_v51  ;;  %904 = vmatmul.msk.f32.gmra.mxu2 %vm741_vm1, %v641_v39 }
 0x143   :  { %897 = vmatmul.msk.f32.gmra.mxu1 %vm741_vm1, %v634_v56  ;;  %905 = vmatmul.msk.f32.gmra.mxu2 %vm741_vm1, %v642_v0 }
 0x14b   :  { %898 = vmatmul.msk.f32.gmra.mxu1 %vm741_vm1, %v635_v23  ;;  %906 = vmatmul.msk.f32.gmra.mxu2 %vm741_vm1, %v643_v38 }
 0x153   :  { %899 = vmatmul.msk.f32.gmra.mxu1 %vm741_vm1, %v636_v12  ;;  %907 = vmatmul.msk.f32.gmra.mxu2 %vm741_vm1, %v644_v34 }
 0x198   :  { %v807_v59 = vpop.f32.mrf.mxu1 }
 0x199   :  { %v808_v44 = vadd.f32 %v807_v59, %v664_v60 }
 0x19b   :  { %855 = vst [vmem:[%s1463_s5] sm:$0xff] %v808_v44 }
 0x19e   :  { %v831_v16 = vpop.f32.mrf.mxu2 }
 0x19f   :  { %v832_v15 = vadd.f32 %v831_v16, %v704_v57 }
 0x1a0   :  { %v810_v18 = vpop.f32.mrf.mxu1 }
 0x1a1   :  { %863 = vst [vmem:[%s1463_s5 + $0x40] sm:$0xff] %v832_v15  ;;  %v811_v7 = vadd.f32 %v810_v18, %v669_v40 }
 0x1a3   :  { %856 = vst [vmem:[%s1463_s5 + $0x8] sm:$0xff] %v811_v7 }
 0x1a6   :  { %v834_v4 = vpop.f32.mrf.mxu2 }
 0x1a7   :  { %v835_v22 = vadd.f32 %v834_v4, %v709_v21 }
 0x1a8   :  { %v813_v25 = vpop.f32.mrf.mxu1 }
 0x1a9   :  { %864 = vst [vmem:[%s1463_s5 + $0x48] sm:$0xff] %v835_v22  ;;  %v814_v1 = vadd.f32 %v813_v25, %v674_v52 }
 0x1ab   :  { %857 = vst [vmem:[%s1463_s5 + $0x10] sm:$0xff] %v814_v1 }
 0x1ae   :  { %v837_v3 = vpop.f32.mrf.mxu2 }
 0x1af   :  { %v838_v10 = vadd.f32 %v837_v3, %v714_v29 }
 0x1b0   :  { %v816_v41 = vpop.f32.mrf.mxu1 }
 0x1b1   :  { %865 = vst [vmem:[%s1463_s5 + $0x50] sm:$0xff] %v838_v10  ;;  %v817_v35 = vadd.f32 %v816_v41, %v679_v13 }
 0x1b3   :  { %858 = vst [vmem:[%s1463_s5 + $0x18] sm:$0xff] %v817_v35 }
 0x1b6   :  { %v840_v63 = vpop.f32.mrf.mxu2 }
 0x1b7   :  { %v841_v50 = vadd.f32 %v840_v63, %v719_v26 }
 0x1b8   :  { %v819_v62 = vpop.f32.mrf.mxu1 }
 0x1b9   :  { %866 = vst [vmem:[%s1463_s5 + $0x58] sm:$0xff] %v841_v50  ;;  %v820_v46 = vadd.f32 %v819_v62, %v684_v47 }
 0x1bb   :  { %859 = vst [vmem:[%s1463_s5 + $0x20] sm:$0xff] %v820_v46 }
 0x1be   :  { %v843_v58 = vpop.f32.mrf.mxu2 }
 0x1bf   :  { %v844_v61 = vadd.f32 %v843_v58, %v724_v43 }
 0x1c0   :  { %v822_v32 = vpop.f32.mrf.mxu1 }
 0x1c1   :  { %867 = vst [vmem:[%s1463_s5 + $0x60] sm:$0xff] %v844_v61  ;;  %v823_v30 = vadd.f32 %v822_v32, %v689_v42 }
 0x1c3   :  { %860 = vst [vmem:[%s1463_s5 + $0x28] sm:$0xff] %v823_v30 }
 0x1c6   :  { %v846_v54 = vpop.f32.mrf.mxu2 }
 0x1c7   :  { %v847_v2 = vadd.f32 %v846_v54, %v729_v55 }
 0x1c8   :  { %v825_v28 = vpop.f32.mrf.mxu1 }
 0x1c9   :  { %868 = vst [vmem:[%s1463_s5 + $0x68] sm:$0xff] %v847_v2  ;;  %v826_v48 = vadd.f32 %v825_v28, %v694_v37 }
 0x1cb   :  { %861 = vst [vmem:[%s1463_s5 + $0x30] sm:$0xff] %v826_v48 }
 0x1ce   :  { %v849_v33 = vpop.f32.mrf.mxu2 }
 0x1cf   :  { %v850_v24 = vadd.f32 %v849_v33, %v734_v49 }
 0x1d0   :  { %v828_v36 = vpop.f32.mrf.mxu1 }
 0x1d1   :  { %869 = vst [vmem:[%s1463_s5 + $0x70] sm:$0xff] %v850_v24  ;;  %v829_v8 = vadd.f32 %v828_v36, %v699_v19 }
 0x1d3   :  { %862 = vst [vmem:[%s1463_s5 + $0x38] sm:$0xff] %v829_v8 }
 0x1d6   :  { %v852_v9 = vpop.f32.mrf.mxu2 }
 0x1d7   :  { %v853_v31 = vadd.f32 %v852_v9, %v739_v45 }
 0x1d9   :  { %870 = vst [vmem:[%s1463_s5 + $0x78] sm:$0xff] %v853_v31 }
 0x1da   :  { %875 = vsyncpa [#allocation3], 1 }
 0x1db   :  { %876 = vsyncpa [#allocation5], 1 }

</bundles_post_ra>
